<compile_context>
chip_gen: v7x
topology: tpu7x:2x2x1
jax: 0.10.0
libtpu: 0.0.40
codegen_flags: <defaults>
</compile_context>

<pallas_src>
import math

import jax
import jax.numpy as jnp
from jax.experimental import pallas as pl
from jax.experimental.pallas import tpu as pltpu


# --------------------------------------------------------------------------- #
# Kernels
# --------------------------------------------------------------------------- #
def _linear_kernel_f32_out(x_ref, w_ref, b_ref, o_ref):
    """float32 output: accumulate straight into the resident output block."""
    k = pl.program_id(2)

    @pl.when(k == 0)
    def _():
        # Initialize with the bias -> bias is added exactly once.
        o_ref[...] = jnp.broadcast_to(b_ref[...], o_ref.shape)

    # (tm, tk) @ (tk, tn): K-major contraction, MXU only, no transposes anywhere.
    o_ref[...] += jnp.dot(x_ref[...], w_ref[...],
                          preferred_element_type=jnp.float32)


def _linear_kernel_acc(x_ref, w_ref, b_ref, o_ref, acc_ref):
    """Low-precision output: f32 VMEM accumulator, cast on the final K step."""
    k = pl.program_id(2)

    @pl.when(k == 0)
    def _():
        acc_ref[...] = jnp.broadcast_to(b_ref[...], acc_ref.shape)

    acc_ref[...] += jnp.dot(x_ref[...], w_ref[...],
                            preferred_element_type=jnp.float32)

    @pl.when(k == pl.num_programs(2) - 1)
    def _():
        o_ref[...] = acc_ref[...].astype(o_ref.dtype)


# --------------------------------------------------------------------------- #
# Tiling / memory helpers
# --------------------------------------------------------------------------- #
def _round_up(x, m):
    return ((x + m - 1) // m) * m


def _pick_tile(dim, target, multiple):
    """Largest `multiple`-aligned tile <= target that divides dim (no padding);
    whole dim if it fits; padded fallback otherwise."""
    dim, target = int(dim), int(target)
    if dim <= target:
        return dim
    t = (target // multiple) * multiple
    while t >= multiple:
        if dim % t == 0:
            return t
        t -= multiple
    return max((target // multiple) * multiple, multiple)


def _pick_tile_n(out_dim, target):
    """N tile: keep the output slab lane-dense (multiple of 128 lanes) when possible
    so stores are unmasked vst instead of vst.msk."""
    out_dim, target = int(out_dim), int(target)
    if out_dim <= target:
        if out_dim < 128 or out_dim % 128 == 0:
            return out_dim
        return _round_up(out_dim, 128)
    return _pick_tile(out_dim, target, 128)


def _maybe_split_for_megacore(m, n, k, tm, tn):
    """Guarantee >=2 parallel (M, N) blocks on non-trivial problems so the second
    v7x TensorCore is not idle (harmless / no-op on v5e/v6e and tiny problems)."""
    if pl.cdiv(m, tm) * pl.cdiv(n, tn) >= 2:
        return tm, tn
    if 2 * m * n * k < (1 << 25):          # < ~32 MFLOP: splitting is pure overhead
        return tm, tn
    if tm % 16 == 0:
        return tm // 2, tn
    if tn % 256 == 0:
        return tm, tn // 2
    return tm, tn


def _pad_axis(a, axis, size):
    pad = size - a.shape[axis]
    if pad == 0:
        return a
    widths = [(0, 0)] * a.ndim
    widths[axis] = (0, pad)
    return jnp.pad(a, widths)


def _vmem_budget_bytes():
    """Generation-aware VMEM cap with ~25% headroom for compiler-internal scratch."""
    cap = None
    try:
        cap = getattr(pltpu.get_tpu_info(), "vmem_capacity_bytes", None)
    except Exception:
        cap = None
    if not cap:
        cap = 64 * 1024 * 1024              # conservative (v7x-sized) fallback
    return int(cap) * 3 // 4                # ~48 MiB on v7x, ~96 MiB on v5e/v6e


# --------------------------------------------------------------------------- #
# Wrapper
# --------------------------------------------------------------------------- #
def linear_norm(x, weight, bias=None, *, weight_layout="torch",
                compute_dtype=None, tm=512, tn=256, tk=1024, buffering=None):
    """y = x @ W.T + b  (forward of the LinearNorm / torch.nn.Linear module).

    x:       [..., in_dim]
    weight:  [out_dim, in_dim] if weight_layout == "torch";
             [in_dim, out_dim] if weight_layout == "kn" (pre-transposed; preferred —
             cache this static copy across calls so no transpose touches the hot path).
    bias:    [out_dim] or None.
    compute_dtype: optional MXU feed dtype (e.g. jnp.bfloat16). Accumulation and the
             bias-add stay float32; output dtype follows x.dtype.
    """
    if weight_layout == "torch":
        out_dim, in_dim = weight.shape
        w_kn = weight.T         # one-time; in real use, store/cache the (K, N) copy
    elif weight_layout == "kn":
        in_dim, out_dim = weight.shape
        w_kn = weight
    else:
        raise ValueError(f"unknown weight_layout: {weight_layout!r}")

    orig_shape = x.shape
    assert orig_shape[-1] == in_dim, (orig_shape, in_dim)
    out_dtype = x.dtype

    m = int(math.prod(orig_shape[:-1])) if len(orig_shape) > 1 else 1
    x2 = x.reshape(m, in_dim)

    if bias is None:
        bias = jnp.zeros((out_dim,), jnp.float32)
    b2 = bias.astype(jnp.float32).reshape(1, out_dim)

    if compute_dtype is not None:
        # Feed the MXU bf16 (f32 accumulate kept); also halves streamed x/W HBM bytes.
        x2 = x2.astype(compute_dtype)
        w_kn = w_kn.astype(compute_dtype)

    # --- tile selection: M sublane-aligned, N/K lane-aligned, divisor-friendly ---
    tm = _pick_tile(m, tm, 8)
    tn = _pick_tile_n(out_dim, tn)
    tk = _pick_tile(in_dim, tk, 128)
    tm, tn = _maybe_split_for_megacore(m, out_dim, in_dim, tm, tn)

    m_pad = pl.cdiv(m, tm) * tm
    n_pad = pl.cdiv(out_dim, tn) * tn
    k_pad = pl.cdiv(in_dim, tk) * tk

    # Padding is materialized only when a dim does not divide its tile (never for the
    # demo shapes). K padding is zeros -> reduction stays exact; padded M rows / N
    # cols are sliced off below.
    # TODO(synk): handle a ragged K tail with an in-kernel iota mask instead of a
    # padded x copy when in_dim has no 128-aligned divisor.
    x2 = _pad_axis(_pad_axis(x2, 0, m_pad), 1, k_pad)
    w_kn = _pad_axis(_pad_axis(w_kn, 0, k_pad), 1, n_pad)
    b2 = _pad_axis(b2, 1, n_pad)

    grid = (m_pad // tm, n_pad // tn, k_pad // tk)

    in_bytes = jnp.dtype(x2.dtype).itemsize
    out_bytes = jnp.dtype(out_dtype).itemsize
    use_inplace = jnp.dtype(out_dtype) == jnp.dtype(jnp.float32)

    bufs = buffering if buffering is not None else 2
    vmem_needed = (bufs * (tm * tk + tk * tn + tn) * in_bytes
                   + 2 * tm * tn * out_bytes
                   + (0 if use_inplace else tm * tn * 4))
    vmem_limit = int(min(max(2 * vmem_needed, 32 * 1024 * 1024),
                         _vmem_budget_bytes()))

    cost = pl.CostEstimate(
        flops=2 * m * in_dim * out_dim,
        transcendentals=0,
        bytes_accessed=(m * in_dim + in_dim * out_dim) * in_bytes
                       + out_dim * 4 + m * out_dim * out_bytes)

    pipeline_kwargs = {}
    if buffering is not None and buffering != 2:
        # Deeper pipelining for DMA-latency-bound (small-M) shapes.
        pipeline_kwargs = dict(pipeline_mode=pl.Buffered(buffering))

    in_specs = [
        pl.BlockSpec((tm, tk), lambda i, j, k: (i, k), **pipeline_kwargs),  # x
        pl.BlockSpec((tk, tn), lambda i, j, k: (k, j), **pipeline_kwargs),  # W (K, N)
        pl.BlockSpec((1, tn), lambda i, j, k: (0, j)),                       # bias
    ]
    out_spec = pl.BlockSpec((tm, tn), lambda i, j, k: (i, j))

    if use_inplace:
        kernel, scratch = _linear_kernel_f32_out, []
    else:
        kernel, scratch = _linear_kernel_acc, [pltpu.VMEM((tm, tn), jnp.float32)]

    out = pl.pallas_call(
        kernel,
        out_shape=jax.ShapeDtypeStruct((m_pad, n_pad), out_dtype),
        grid_spec=pltpu.PrefetchScalarGridSpec(
            num_scalar_prefetch=0,
            grid=grid,
            in_specs=in_specs,
            out_specs=out_spec,
            scratch_shapes=scratch,
        ),
        compiler_params=pltpu.CompilerParams(
            dimension_semantics=("parallel", "parallel", "arbitrary"),
            vmem_limit_bytes=vmem_limit),
        cost_estimate=cost,
    )(x2, w_kn, b2)

    out = out[:m, :out_dim]
    return out.reshape(*orig_shape[:-1], out_dim)


# --------------------------------------------------------------------------- #
# Parameter init (matches the PyTorch module, including calculate_gain)
# --------------------------------------------------------------------------- #
_GAINS = {
    "linear": 1.0, "identity": 1.0, "sigmoid": 1.0, "conv1d": 1.0, "conv2d": 1.0,
    "conv3d": 1.0, "tanh": 5.0 / 3.0, "relu": math.sqrt(2.0),
    "leaky_relu": math.sqrt(2.0 / (1.0 + 0.01 ** 2)),
}


def init_linear_norm_params(key, in_dim, out_dim, w_init_gain="linear", use_bias=True):
    """xavier_uniform_(gain=calculate_gain(w_init_gain)) weight + torch bias init."""
    gain = _GAINS[w_init_gain]
    limit = gain * math.sqrt(6.0 / (in_dim + out_dim))
    k_w, k_b = jax.random.split(key)
    weight = jax.random.uniform(k_w, (out_dim, in_dim), jnp.float32,
                                minval=-limit, maxval=limit)
    if not use_bias:
        return weight, None
    b_lim = 1.0 / math.sqrt(in_dim)
    bias = jax.random.uniform(k_b, (out_dim,), jnp.float32,
                              minval=-b_lim, maxval=b_lim)
    return weight, bias


if __name__ == "__main__":
    key = jax.random.PRNGKey(0)
    k_x, k_p, k_x2, k_p2, k_x3, k_p3 = jax.random.split(key, 6)

    # 1) Small demo shapes (single-block path, torch-layout weight).
    batch, seq, in_dim, out_dim = 2, 8, 32, 64
    x = jax.random.normal(k_x, (batch, seq, in_dim), jnp.float32)
    weight, bias = init_linear_norm_params(k_p, in_dim, out_dim, "linear")
    y = jax.block_until_ready(linear_norm(x, weight, bias))
    y_ref = x @ weight.T + bias
    assert y.shape == (batch, seq, out_dim)
    assert jnp.allclose(y, y_ref, atol=1e-5, rtol=1e-5)

    # 2) M/N/K tiled path (multi-block grid + K accumulation), cached (K, N) weight.
    m2, k2, n2 = 384, 256, 384
    xb = jax.random.normal(k_x2, (m2, k2), jnp.float32)
    wb, bb = init_linear_norm_params(k_p2, k2, n2, "linear")
    wb_t = wb.T                                   # cached pre-transposed static param
    yb = jax.block_until_ready(
        linear_norm(xb, wb_t, bb, weight_layout="kn", tm=128, tn=128, tk=128))
    yb_ref = xb @ wb.T + bb
    assert jnp.allclose(yb, yb_ref, atol=1e-4, rtol=1e-4)

    # 3) Ragged N (lane-dense padded output slab) with the default big tiles.
    m3, k3, n3 = 200, 160, 192
    xc = jax.random.normal(k_x3, (m3, k3), jnp.float32)
    wc, bc = init_linear_norm_params(k_p3, k3, n3, "relu")
    yc = jax.block_until_ready(linear_norm(xc, wc, bc))
    yc_ref = xc @ wc.T + bc
    assert yc.shape == (m3, n3)
    assert jnp.allclose(yc, yc_ref, atol=1e-4, rtol=1e-4)

    # 4) bf16 MXU feed (f32 accumulate, f32 output): looser tolerance vs f32 ref.
    yd = jax.block_until_ready(
        linear_norm(xb, wb_t, bb, weight_layout="kn", compute_dtype=jnp.bfloat16))
    assert jnp.allclose(yd, yb_ref, atol=1e-1, rtol=5e-2)

    print("KERNEL_OK")
</pallas_src>

<mosaic_0001>
module attributes {stable_mosaic.version = 11 : i64} {
  func.func @_linear_kernel_f32_out(%arg0: i32, %arg1: i32, %arg2: i32, %arg3: memref<16x32xf32, #tpu.memory_space<vmem>>, %arg4: memref<32x64xf32, #tpu.memory_space<vmem>>, %arg5: memref<1x64xf32, #tpu.memory_space<vmem>>, %arg6: memref<16x64xf32, #tpu.memory_space<vmem>>) attributes {dimension_semantics = [#tpu.dimension_semantics<parallel>, #tpu.dimension_semantics<parallel>, #tpu.dimension_semantics<arbitrary>], iteration_bounds = array<i64: 1, 1, 1>, scalar_prefetch = 0 : i64, scratch_operands = 0 : i64, tpu.core_type = #tpu.core_type<tc>, window_params = [{transform_indices = @transform_0, window_bounds = array<i64: 16, 32>}, {transform_indices = @transform_1, window_bounds = array<i64: 32, 64>}, {transform_indices = @transform_2, window_bounds = array<i64: 1, 64>}, {transform_indices = @transform_3, window_bounds = array<i64: 16, 64>}]} {
    %c0_i32 = arith.constant 0 : i32
    %0 = arith.cmpi eq, %arg2, %c0_i32 : i32
    %1 = arith.extui %0 : i1 to i32
    %c0_i32_0 = arith.constant 0 : i32
    %2 = arith.cmpi ne, %1, %c0_i32_0 : i32
    scf.if %2 {
      %c0_8 = arith.constant 0 : index
      %c0_9 = arith.constant 0 : index
      %9 = vector.load %arg5[%c0_8, %c0_9] : memref<1x64xf32, #tpu.memory_space<vmem>>, vector<1x64xf32>
      %10 = vector.shape_cast %9 : vector<1x64xf32> to vector<1x64xf32>
      %11 = vector.broadcast %10 : vector<1x64xf32> to vector<16x64xf32>
      %c0_10 = arith.constant 0 : index
      %c0_11 = arith.constant 0 : index
      %12 = vector.load %arg6[%c0_10, %c0_11] : memref<16x64xf32, #tpu.memory_space<vmem>>, vector<16x64xf32>
      tpu.vector_store %arg6[%c0_10, %c0_11], %11 {strides = array<i32>} : memref<16x64xf32, #tpu.memory_space<vmem>>, vector<16x64xf32>,
    } else {
    }
    %c0 = arith.constant 0 : index
    %c0_1 = arith.constant 0 : index
    %3 = vector.load %arg6[%c0, %c0_1] : memref<16x64xf32, #tpu.memory_space<vmem>>, vector<16x64xf32>
    %c0_2 = arith.constant 0 : index
    %c0_3 = arith.constant 0 : index
    %4 = vector.load %arg3[%c0_2, %c0_3] : memref<16x32xf32, #tpu.memory_space<vmem>>, vector<16x32xf32>
    %c0_4 = arith.constant 0 : index
    %c0_5 = arith.constant 0 : index
    %5 = vector.load %arg4[%c0_4, %c0_5] : memref<32x64xf32, #tpu.memory_space<vmem>>, vector<32x64xf32>
    %cst = arith.constant dense<0.000000e+00> : vector<16x64xf32>
    %6 = tpu.matmul %4, %5, %cst {dimension_numbers = #tpu.dot_dimension_numbers<[1], [0], [0], [1], [0, 0, 1, 1], [], []>} : vector<16x32xf32>, vector<32x64xf32>, vector<16x64xf32> -> vector<16x64xf32>
    %7 = arith.addf %3, %6 : vector<16x64xf32>
    %c0_6 = arith.constant 0 : index
    %c0_7 = arith.constant 0 : index
    %8 = vector.load %arg6[%c0_6, %c0_7] : memref<16x64xf32, #tpu.memory_space<vmem>>, vector<16x64xf32>
    tpu.vector_store %arg6[%c0_6, %c0_7], %7 {strides = array<i32>} : memref<16x64xf32, #tpu.memory_space<vmem>>, vector<16x64xf32>,
    return
  }
  func.func @transform_0(%arg0: i32, %arg1: i32, %arg2: i32) -> (i32, i32) {
    %c0_i32 = arith.constant 0 : i32
    return %arg0, %arg2 : i32, i32
  }
  func.func @transform_1(%arg0: i32, %arg1: i32, %arg2: i32) -> (i32, i32) {
    %c0_i32 = arith.constant 0 : i32
    return %arg2, %arg1 : i32, i32
  }
  func.func @transform_2(%arg0: i32, %arg1: i32, %arg2: i32) -> (i32, i32) {
    %c0_i32 = arith.constant 0 : i32
    %c0_i32_0 = arith.constant 0 : i32
    return %c0_i32, %arg1 : i32, i32
  }
  func.func @transform_3(%arg0: i32, %arg1: i32, %arg2: i32) -> (i32, i32) {
    %c0_i32 = arith.constant 0 : i32
    return %arg0, %arg1 : i32, i32
  }
}

</mosaic_0001>

<bundles_post_ra>
// kernel: tpu_custom_call.1
= control target key start
LH: loop header
LB: loop body
LE: loop exit
PB: predicated region body
PF: predicated region fallthrough
CT: control target
= control target key end

     0   :  { %8 = vsyncpa [#allocation3], 0  ;;  %s354_s0 = inlined_call_operand.hbm [shape: f32[16,32], index: 0, kind: input, shape index: {}]   ;;  %s355_s1 = inlined_call_operand.hbm [shape: f32[32,64], index: 1, kind: input, shape index: {}]   ;;  %s356_s2 = inlined_call_operand.vmem [shape: f32[1,64], index: 2, kind: input, shape index: {}]   ;;  %s357_s3 = inlined_call_operand.hbm [shape: f32[16,64], index: 3, kind: output, shape index: {}]  }
   0x1   :  { %9 = vsyncpa [#allocation6], 0 }
   0x2   :  { %10 = vsyncpa [#allocation4], 0  ;;  %s275_s12 = smov [#allocation2]   ;;  %s203_s16 = scalar_lea.hbm %s354_s0, 256 }
   0x3   :  { %s16_s13 = sshll.u32 %s275_s12, 4  ;;  %p204_p0 = scmp.ne.s32.totalorder %s354_s0, %s203_s16  ;;  %s17_s13 = int_to_ptr.vmem [resolvable:$true] %s16_s13 }
   0x4   :  { %p207_p1 = scmp.lt.u32.totalorder %s203_s16, %s354_s0 }
   0x6   :  { %p209_p2 = pnand %p207_p1, %p204_p0 }
   0x8   :  { %212 = shalt.err (!%p209_p2)
}
   0x9   :  { %s213_s21 = scalar_lea.vmem %s17_s13, 256  ;;  %p218_p4 = scmp.lt.s32.totalorder %s17_s13, %s17_s13 }
   0xa   :  { %p214_p3 = scmp.ne.s32.totalorder %s17_s13, %s213_s21  ;;  %p219_p5 = scmp.lt.s32.totalorder %s213_s21, %s213_s21 }
   0xc   :  { %p220_p6 = por %p219_p5, %p218_p4 }
   0xe   :  { %p221_p7 = pnand %p220_p6, %p214_p3 }
  0x10   :  { %224 = shalt.err (!%p221_p7)
}
  0x11   :  { %s276_s22 = smov 128   ;;  %s277_s23 = smov 8  }
  0x12   :  { %22 = dma.hbm_to_vmem [thread:$0]  %s354_s0, 256, %s17_s13, [#allocation3], %s276_s22, %s276_s22, %s277_s23  }
  0x13   :  { %s278_s26 = smov [#allocation5]   ;;  %s225_s30 = scalar_lea.hbm %s355_s1, 512 }
  0x14   :  { %s28_s27 = sshll.u32 %s278_s26, 4  ;;  %p226_p8 = scmp.ne.s32.totalorder %s355_s1, %s225_s30  ;;  %s29_s27 = int_to_ptr.vmem [resolvable:$true] %s28_s27 }
  0x15   :  { %p229_p9 = scmp.lt.u32.totalorder %s225_s30, %s355_s1 }
  0x17   :  { %p231_p10 = pnand %p229_p9, %p226_p8 }
  0x19   :  { %234 = shalt.err (!%p231_p10)
}
  0x1a   :  { %s235_s8 = scalar_lea.vmem %s29_s27, 512  ;;  %p240_p12 = scmp.lt.s32.totalorder %s29_s27, %s29_s27 }
  0x1b   :  { %p236_p11 = scmp.ne.s32.totalorder %s29_s27, %s235_s8  ;;  %p241_p13 = scmp.lt.s32.totalorder %s235_s8, %s235_s8 }
  0x1d   :  { %p242_p0 = por %p241_p13, %p240_p12 }
  0x1f   :  { %p243_p1 = pnand %p242_p0, %p236_p11 }
  0x21   :  { %246 = shalt.err (!%p243_p1)
}
  0x22   :  { %34 = dma.hbm_to_vmem [thread:$0]  %s355_s1, 512, %s29_s27, [#allocation6], %s276_s22, %s276_s22, %s277_s23  }
  0x23   :  { %269 = dma.done.wait [#allocation3], 256  }
  0x24   :  { %270 = vsyncadd [#allocation3], 4294967040 }
  0x25   :  { %271 = dma.done.wait [#allocation6], 512  }
  0x26   :  { %272 = vsyncadd [#allocation6], 4294966784  ;;  %vm65_vm0 = vcmask 261120   ;;  %v61_v0 = vld [vmem:[#allocation5] sm:$0xff]  ;;  %v62_v1 = vld [vmem:[#allocation5 + $0x8] sm:$0xff]  ;;  %vm54_vm1 = vcmask 523264  }
  0x27   :  { %v63_v2 = vld [vmem:[#allocation5 + $0x10] sm:$0xff]  ;;  %v190_v3 = vpack.c.bf16 %v62_v1, %v61_v0  ;;  %v64_v4 = vld [vmem:[#allocation5 + $0x18] sm:$0xff]  ;;  %s279_s1 = smov [#allocation7]  }
  0x28   :  { %v59_v5 = vld [vmem:[#allocation2] sm:$0xff]  ;;  %v194_v6 = vpack.c.bf16 %v64_v4, %v63_v2  ;;  %v60_v8 = vld [vmem:[#allocation2 + $0x8] sm:$0xff]  ;;  %s157_s12 = sshll.u32 %s279_s1, 4  ;;  %s158_s12 = int_to_ptr.vmem [resolvable:$true] %s157_s12 }
  0x29   :  { %187 = vmatprep.mubr.msk.f32.mxu0 %vm65_vm0, %v59_v5  ;;  %v170_v7 = vld [vmem:[%s356_s2] ss:$0 sm:$0xff]  ;;  %191 = vmatprep.subr.bf16.mxu0 %v190_v3  ;;  %s247_s2 = scalar_lea.vmem %s158_s12, 256  ;;  %p252_p3 = scmp.lt.s32.totalorder %s158_s12, %s158_s12 }
  0x2a   :  { %56 = vst.msk [vmem:[#allocation7 + $0x8] sm:$0xff] %vm54_vm1, %v170_v7  ;;  %55 = vst.msk [vmem:[#allocation7] sm:$0xff] %vm54_vm1, %v170_v7  ;;  %193 = vmatpush3.bf16.msra.mxu0 %v190_v3  ;;  %p248_p2 = scmp.ne.s32.totalorder %s158_s12, %s247_s2  ;;  %p253_p4 = scmp.lt.s32.totalorder %s247_s2, %s247_s2 }
  0x2b   :  { %195 = vmatprep.subr.bf16.mxu0 %v194_v6 }
  0x2c   :  { %p254_p5 = por %p253_p4, %p252_p3 }
  0x2e   :  { %197 = vmatpush3.bf16.msra.mxu0 %v194_v6  ;;  %p255_p6 = pnand %p254_p5, %p248_p2 }
  0x31   :  { %188 = vmatmul.mubr.msk.f32.vlgmr.msra.gmra.mrb[0].mxu0 %vm65_vm0, %v60_v8  ;;  %v58_v9 = vld [vmem:[#allocation7 + $0x8] sm:$0xff]  ;;  %v57_v10 = vld [vmem:[#allocation7] sm:$0xff] }
 0x104   :  { %v189_v11 = vpop.f32.mrb[0].mxu0 }
 0x105   :  { %v148_v12 = vadd.f32 %v189_v11, %v58_v9  ;;  %v138_v13 = vpop.f32.mrb[1].mxu0 }
 0x106   :  { %v147_v14 = vadd.f32 %v138_v13, %v57_v10 }
 0x107   :  { %151 = vst.msk [vmem:[#allocation7 + $0x8] sm:$0xff] %vm54_vm1, %v148_v12 }
 0x108   :  { %150 = vst.msk [vmem:[#allocation7] sm:$0xff] %vm54_vm1, %v147_v14 }
 0x109   :  { %258 = shalt.err (!%p255_p6)
}
 0x10a   :  { %s259_s15 = scalar_lea.hbm %s357_s3, 256 }
 0x10b   :  { %p260_p7 = scmp.ne.s32.totalorder %s357_s3, %s259_s15  ;;  %p263_p8 = scmp.lt.u32.totalorder %s259_s15, %s357_s3 }
 0x10d   :  { %p265_p9 = pnand %p263_p8, %p260_p7 }
 0x10f   :  { %268 = shalt.err (!%p265_p9)
}
 0x110   :  { %163 = dma.vmem_to_hbm [thread:$0]  %s158_s12, 256, %s357_s3, [#allocation4], %s276_s22, %s276_s22, %s277_s23  }
 0x111   :  { %273 = dma.done.wait [#allocation4], 256  }
 0x112   :  { %274 = vsyncadd [#allocation4], 4294967040 }
 0x113   :  { %167 = vsyncpa [#allocation3], 1 }
 0x114   :  { %168 = vsyncpa [#allocation6], 1 }
 0x115   :  { %169 = vsyncpa [#allocation4], 1 }

</bundles_post_ra>
